<compile_context>
chip_gen: v7x
topology: tpu7x:2x2x1
jax: 0.10.0
libtpu: 0.0.40
codegen_flags: <defaults>
</compile_context>

<pallas_src>
import functools

import jax
import jax.numpy as jnp
from jax.experimental import pallas as pl
from jax.experimental.pallas import tpu as pltpu


def _make_varub_kernel(n_rows, tile_n, num_tiles, y_dim):
    needs_mask = (num_tiles * tile_n) != n_rows

    def kernel(x_ref, w1_ref, b1_ref, w2_ref, b2_ref, out_ref):
        # In-kernel bf16 cast: rides in spare VPU slots while the kernel is
        # HBM-bound, instead of a separate XLA cast kernel over all of x.
        x = x_ref[...].astype(jnp.bfloat16)                  # (TN, x_dim)

        # Fused first layer for both branches -> [h_mu | h_logvar], f32 acc.
        h = jnp.dot(x, w1_ref[...],
                    preferred_element_type=jnp.float32) + b1_ref[...]
        h = jnp.maximum(h, 0.0)

        # Fused (block-diagonal) second layer -> [mu_pre | logvar_pre].
        z = jnp.dot(h.astype(jnp.bfloat16), w2_ref[...],
                    preferred_element_type=jnp.float32) + b2_ref[...]
        mu = z[:, :y_dim]
        logvar = jnp.tanh(z[:, y_dim:])

        val = mu * mu + jnp.exp(logvar) - 1.0 - logvar       # (TN, y_dim) f32

        def write(v):
            # Sublane reduce first, then the tiny cross-lane reduce (XLU);
            # write a full aligned (8,128) slab -> unmasked vst, no false
            # sharing between grid steps / TensorCores.
            tile_sum = jnp.sum(jnp.sum(v, axis=0, keepdims=True))
            out_ref[...] = jnp.full((1, 8, 128), tile_sum, dtype=jnp.float32)

        if needs_mask:
            i = pl.program_id(0)
            last = num_tiles - 1

            @pl.when(i < last)
            def _():
                write(val)                                   # hot path: no mask

            @pl.when(i == last)
            def _():
                # Mask padded rows BEFORE the axis-0 reduction (select zeroes
                # out any NaN/Inf produced from uninitialized padded rows).
                row = (jax.lax.broadcasted_iota(jnp.int32, (tile_n, 1), 0)
                       + i * tile_n)
                write(jnp.where(row < n_rows, val, 0.0))
        else:
            write(val)

    return kernel


def _fuse_params(params):
    (w1m, b1m, w2m, b2m, w1l, b1l, w2l, b2l) = params
    h = w1m.shape[1]
    y_dim = w2m.shape[1]
    w1f = jnp.concatenate([w1m, w1l], axis=1)                     # (x_dim, 2h)
    b1f = jnp.concatenate([b1m, b1l], axis=1)                     # (1, 2h)
    w2f = jnp.zeros((2 * h, 2 * y_dim), jnp.float32)
    w2f = w2f.at[:h, :y_dim].set(w2m).at[h:, y_dim:].set(w2l)     # block-diag
    b2f = jnp.concatenate([b2m, b2l], axis=1)                     # (1, 2*y_dim)
    return (w1f.astype(jnp.bfloat16), b1f,
            w2f.astype(jnp.bfloat16), b2f, y_dim)


def _choose_tile(n, tile_n):
    """Row-tile size: single tile if the batch fits, else a sublane-multiple
    tile, biased toward an even tile count (2-TC sharding on v7x)."""
    if n <= tile_n:
        return n
    tn = ((tile_n + 7) // 8) * 8
    num = pl.cdiv(n, tn)
    if num % 2 == 1:
        tn_even = ((pl.cdiv(n, num + 1) + 7) // 8) * 8
        if pl.cdiv(n, tn_even) == num + 1:
            tn = tn_even
    return tn


@functools.partial(jax.jit, static_argnames=("tile_n",))
def varub_forward(x_samples, y_samples, params, *, tile_n=8192):
    # y_samples is unused in forward(); kept for API parity with the nn.Module.
    del y_samples
    n, x_dim = x_samples.shape
    w1f, b1f, w2f, b2f, y_dim = _fuse_params(params)

    tn = _choose_tile(n, tile_n)
    num_tiles = pl.cdiv(n, tn)
    kernel = _make_varub_kernel(n, tn, num_tiles, y_dim)

    two_h = w1f.shape[1]
    two_y = w2f.shape[1]
    cost = pl.CostEstimate(
        flops=2 * n * (x_dim * two_h + two_h * two_y) + 8 * n * y_dim,
        transcendentals=2 * n * y_dim,              # tanh + exp per element
        bytes_accessed=(n * x_dim * 4
                        + (w1f.size + w2f.size) * 2
                        + (b1f.size + b2f.size) * 4
                        + num_tiles * 8 * 128 * 4),
    )

    partial = pl.pallas_call(
        kernel,
        out_shape=jax.ShapeDtypeStruct((num_tiles, 8, 128), jnp.float32),
        grid=(num_tiles,),
        in_specs=[
            pl.BlockSpec((tn, x_dim), lambda i: (i, 0)),      # tiled x (f32)
            pl.BlockSpec(w1f.shape, lambda i: (0, 0)),        # VMEM-resident
            pl.BlockSpec(b1f.shape, lambda i: (0, 0)),
            pl.BlockSpec(w2f.shape, lambda i: (0, 0)),
            pl.BlockSpec(b2f.shape, lambda i: (0, 0)),
        ],
        out_specs=pl.BlockSpec((1, 8, 128), lambda i: (i, 0, 0)),
        compiler_params=pltpu.CompilerParams(
            dimension_semantics=("parallel",)),
        cost_estimate=cost,
    )(x_samples, w1f, b1f, w2f, b2f)

    # Finalize exactly once: divide by N*y_dim and apply the 0.5 factor.
    return 0.5 * jnp.sum(partial[:, 0, 0]) / (n * y_dim)


def init_params(key, x_dim, y_dim, hidden_size):
    h = hidden_size // 2
    keys = jax.random.split(key, 8)

    def linear_init(kw, kb, fan_in, fan_out):
        # Mimic PyTorch nn.Linear default init: U(-1/sqrt(fan_in), 1/sqrt(fan_in))
        bound = 1.0 / jnp.sqrt(jnp.float32(fan_in))
        w = jax.random.uniform(kw, (fan_in, fan_out), jnp.float32, -bound, bound)
        b = jax.random.uniform(kb, (1, fan_out), jnp.float32, -bound, bound)
        return w, b

    w1m, b1m = linear_init(keys[0], keys[1], x_dim, h)
    w2m, b2m = linear_init(keys[2], keys[3], h, y_dim)
    w1l, b1l = linear_init(keys[4], keys[5], x_dim, h)
    w2l, b2l = linear_init(keys[6], keys[7], h, y_dim)
    return (w1m, b1m, w2m, b2m, w1l, b1l, w2l, b2l)


def varub_forward_ref(x, params, *, bf16_dots=False):
    (w1m, b1m, w2m, b2m, w1l, b1l, w2l, b2l) = params

    def dot(a, b):
        if bf16_dots:
            a = a.astype(jnp.bfloat16)
            b = b.astype(jnp.bfloat16)
        return jnp.dot(a, b, preferred_element_type=jnp.float32)

    h_mu = jnp.maximum(dot(x, w1m) + b1m, 0.0)
    mu = dot(h_mu, w2m) + b2m
    h_lv = jnp.maximum(dot(x, w1l) + b1l, 0.0)
    logvar = jnp.tanh(dot(h_lv, w2l) + b2l)
    return 0.5 * jnp.mean(mu ** 2 + jnp.exp(logvar) - 1.0 - logvar)


if __name__ == "__main__":
    x_dim, y_dim, hidden_size, batch = 32, 8, 32, 8

    key = jax.random.PRNGKey(0)
    k_params, k_x, k_y = jax.random.split(key, 3)

    params = init_params(k_params, x_dim, y_dim, hidden_size)
    x_samples = jax.random.normal(k_x, (batch, x_dim), jnp.float32)
    y_samples = jax.random.normal(k_y, (batch, y_dim), jnp.float32)

    out = jax.block_until_ready(varub_forward(x_samples, y_samples, params))

    # Precision-matched (bf16-dot) reference: tight check.
    ref_bf16 = varub_forward_ref(x_samples, params, bf16_dots=True)
    assert jnp.allclose(out, ref_bf16, rtol=2e-3, atol=2e-3), (out, ref_bf16)
    # Full-f32 reference: looser check covering the bf16 MXU cast.
    ref_f32 = varub_forward_ref(x_samples, params, bf16_dots=False)
    assert jnp.allclose(out, ref_f32, rtol=5e-2, atol=5e-3), (out, ref_f32)

    # Multi-tile grid + ragged tail (exercises the pl.when-gated last-tile mask).
    n2 = 20
    x2 = jax.random.normal(jax.random.PRNGKey(1), (n2, x_dim), jnp.float32)
    y2 = jax.random.normal(jax.random.PRNGKey(2), (n2, y_dim), jnp.float32)
    out2 = jax.block_until_ready(varub_forward(x2, y2, params, tile_n=16))
    ref2 = varub_forward_ref(x2, params, bf16_dots=True)
    assert jnp.allclose(out2, ref2, rtol=2e-3, atol=2e-3), (out2, ref2)

    # Multi-tile grid, divisible batch (no mask), even tile count path.
    n3 = 2048
    x3 = jax.random.normal(jax.random.PRNGKey(3), (n3, x_dim), jnp.float32)
    y3 = jax.random.normal(jax.random.PRNGKey(4), (n3, y_dim), jnp.float32)
    out3 = jax.block_until_ready(varub_forward(x3, y3, params, tile_n=512))
    ref3 = varub_forward_ref(x3, params, bf16_dots=True)
    assert jnp.allclose(out3, ref3, rtol=2e-3, atol=2e-3), (out3, ref3)

    print("KERNEL_OK")
</pallas_src>

<mosaic_0001>
module attributes {stable_mosaic.version = 11 : i64} {
  func.func @kernel(%arg0: i32, %arg1: memref<8x32xf32, #tpu.memory_space<vmem>>, %arg2: memref<32x32xbf16, #tpu.memory_space<vmem>>, %arg3: memref<1x32xf32, #tpu.memory_space<vmem>>, %arg4: memref<32x16xbf16, #tpu.memory_space<vmem>>, %arg5: memref<1x16xf32, #tpu.memory_space<vmem>>, %arg6: memref<1x8x128xf32, #tpu.memory_space<vmem>>) attributes {dimension_semantics = [#tpu.dimension_semantics<parallel>], iteration_bounds = array<i64: 1>, scalar_prefetch = 0 : i64, scratch_operands = 0 : i64, tpu.core_type = #tpu.core_type<tc>, window_params = [{transform_indices = @transform_0, window_bounds = array<i64: 8, 32>}, {pipeline_mode = #tpu.pipeline_mode<synchronous>, transform_indices = @transform_1, window_bounds = array<i64: 32, 32>}, {pipeline_mode = #tpu.pipeline_mode<synchronous>, transform_indices = @transform_2, window_bounds = array<i64: 1, 32>}, {pipeline_mode = #tpu.pipeline_mode<synchronous>, transform_indices = @transform_3, window_bounds = array<i64: 32, 16>}, {pipeline_mode = #tpu.pipeline_mode<synchronous>, transform_indices = @transform_4, window_bounds = array<i64: 1, 16>}, {transform_indices = @transform_5, window_bounds = array<i64: 1, 8, 128>}]} {
    %c0 = arith.constant 0 : index
    %c0_0 = arith.constant 0 : index
    %0 = vector.load %arg1[%c0, %c0_0] : memref<8x32xf32, #tpu.memory_space<vmem>>, vector<8x32xf32>
    %1 = arith.truncf %0 : vector<8x32xf32> to vector<8x32xbf16>
    %c0_1 = arith.constant 0 : index
    %c0_2 = arith.constant 0 : index
    %2 = vector.load %arg2[%c0_1, %c0_2] : memref<32x32xbf16, #tpu.memory_space<vmem>>, vector<32x32xbf16>
    %cst = arith.constant dense<0.000000e+00> : vector<8x32xf32>
    %3 = tpu.matmul %1, %2, %cst {dimension_numbers = #tpu.dot_dimension_numbers<[1], [0], [0], [1], [0, 0, 1, 1], [], []>} : vector<8x32xbf16>, vector<32x32xbf16>, vector<8x32xf32> -> vector<8x32xf32>
    %c0_3 = arith.constant 0 : index
    %c0_4 = arith.constant 0 : index
    %4 = vector.load %arg3[%c0_3, %c0_4] : memref<1x32xf32, #tpu.memory_space<vmem>>, vector<1x32xf32>
    %5 = vector.broadcast %4 : vector<1x32xf32> to vector<8x32xf32>
    %6 = arith.addf %3, %5 : vector<8x32xf32>
    %cst_5 = arith.constant 0.000000e+00 : f32
    %7 = vector.broadcast %cst_5 : f32 to vector<8x32xf32>
    %8 = arith.maximumf %6, %7 : vector<8x32xf32>
    %9 = arith.truncf %8 : vector<8x32xf32> to vector<8x32xbf16>
    %c0_6 = arith.constant 0 : index
    %c0_7 = arith.constant 0 : index
    %10 = vector.load %arg4[%c0_6, %c0_7] : memref<32x16xbf16, #tpu.memory_space<vmem>>, vector<32x16xbf16>
    %cst_8 = arith.constant dense<0.000000e+00> : vector<8x16xf32>
    %11 = tpu.matmul %9, %10, %cst_8 {dimension_numbers = #tpu.dot_dimension_numbers<[1], [0], [0], [1], [0, 0, 1, 1], [], []>} : vector<8x32xbf16>, vector<32x16xbf16>, vector<8x16xf32> -> vector<8x16xf32>
    %c0_9 = arith.constant 0 : index
    %c0_10 = arith.constant 0 : index
    %12 = vector.load %arg5[%c0_9, %c0_10] : memref<1x16xf32, #tpu.memory_space<vmem>>, vector<1x16xf32>
    %13 = vector.broadcast %12 : vector<1x16xf32> to vector<8x16xf32>
    %14 = arith.addf %11, %13 : vector<8x16xf32>
    %15 = vector.extract_strided_slice %14 {offsets = [0, 0], sizes = [8, 8], strides = [1, 1]} : vector<8x16xf32> to vector<8x8xf32>
    %16 = vector.extract_strided_slice %14 {offsets = [0, 8], sizes = [8, 8], strides = [1, 1]} : vector<8x16xf32> to vector<8x8xf32>
    %17 = math.tanh %16 : vector<8x8xf32>
    %18 = arith.mulf %15, %15 : vector<8x8xf32>
    %19 = math.exp %17 : vector<8x8xf32>
    %20 = arith.addf %18, %19 : vector<8x8xf32>
    %cst_11 = arith.constant 1.000000e+00 : f32
    %21 = vector.broadcast %cst_11 : f32 to vector<8x8xf32>
    %22 = arith.subf %20, %21 : vector<8x8xf32>
    %23 = arith.subf %22, %17 : vector<8x8xf32>
    %cst_12 = arith.constant dense<0.000000e+00> : vector<8xf32>
    %24 = vector.multi_reduction <add>, %23, %cst_12 [0] : vector<8x8xf32> to vector<8xf32>
    %25 = vector.shape_cast %24 : vector<8xf32> to vector<1x8xf32>
    %26 = vector.shape_cast %25 : vector<1x8xf32> to vector<1x1x8xf32>
    %cst_13 = arith.constant dense<0.000000e+00> : vector<1xf32>
    %27 = vector.multi_reduction <add>, %26, %cst_13 [1, 2] : vector<1x1x8xf32> to vector<1xf32>
    %28 = vector.shape_cast %27 : vector<1xf32> to vector<1x1x1xf32>
    %29 = vector.extract %28[0, 0, 0] : f32 from vector<1x1x1xf32>
    %30 = vector.broadcast %29 : f32 to vector<1x8x128xf32>
    %c0_14 = arith.constant 0 : index
    %c0_15 = arith.constant 0 : index
    %c0_16 = arith.constant 0 : index
    %31 = vector.load %arg6[%c0_14, %c0_15, %c0_16] : memref<1x8x128xf32, #tpu.memory_space<vmem>>, vector<1x8x128xf32>
    tpu.vector_store %arg6[%c0_14, %c0_15, %c0_16], %30 {strides = array<i32>} : memref<1x8x128xf32, #tpu.memory_space<vmem>>, vector<1x8x128xf32>,
    return
  }
  func.func @transform_0(%arg0: i32) -> (i32, i32) {
    %c0_i32 = arith.constant 0 : i32
    %c0_i32_0 = arith.constant 0 : i32
    return %arg0, %c0_i32 : i32, i32
  }
  func.func @transform_1(%arg0: i32) -> (i32, i32) {
    %c0_i32 = arith.constant 0 : i32
    %c0_i32_0 = arith.constant 0 : i32
    %c0_i32_1 = arith.constant 0 : i32
    return %c0_i32, %c0_i32_0 : i32, i32
  }
  func.func @transform_2(%arg0: i32) -> (i32, i32) {
    %c0_i32 = arith.constant 0 : i32
    %c0_i32_0 = arith.constant 0 : i32
    %c0_i32_1 = arith.constant 0 : i32
    return %c0_i32, %c0_i32_0 : i32, i32
  }
  func.func @transform_3(%arg0: i32) -> (i32, i32) {
    %c0_i32 = arith.constant 0 : i32
    %c0_i32_0 = arith.constant 0 : i32
    %c0_i32_1 = arith.constant 0 : i32
    return %c0_i32, %c0_i32_0 : i32, i32
  }
  func.func @transform_4(%arg0: i32) -> (i32, i32) {
    %c0_i32 = arith.constant 0 : i32
    %c0_i32_0 = arith.constant 0 : i32
    %c0_i32_1 = arith.constant 0 : i32
    return %c0_i32, %c0_i32_0 : i32, i32
  }
  func.func @transform_5(%arg0: i32) -> (i32, i32, i32) {
    %c0_i32 = arith.constant 0 : i32
    %c0_i32_0 = arith.constant 0 : i32
    %c0_i32_1 = arith.constant 0 : i32
    return %arg0, %c0_i32, %c0_i32_0 : i32, i32, i32
  }
}

</mosaic_0001>

<bundles_post_ra>
// kernel: varub_forward.1
= control target key start
LH: loop header
LB: loop body
LE: loop exit
PB: predicated region body
PF: predicated region fallthrough
CT: control target
= control target key end

     0   :  { %v242_v0 = vmov 0.0   ;;  %vm243_vm0 = vmmov 0   ;;  %vm46_vm1 = vcmask 261120   ;;  %vm173_vm2 = vcmask 64512   ;;  %s301_s1 = inlined_call_operand.vmem [shape: bf16[32,32], index: 1, kind: input, shape index: {}]   ;;  %s302_s0 = inlined_call_operand.vmem [shape: f32[8,32], index: 0, kind: input, shape index: {}]   ;;  %s303_s3 = inlined_call_operand.vmem [shape: bf16[32,16], index: 3, kind: input, shape index: {}]   ;;  %s304_s2 = inlined_call_operand.vmem [shape: f32[1,32], index: 2, kind: input, shape index: {}]   ;;  %s305_s4 = inlined_call_operand.vmem [shape: f32[1,16], index: 4, kind: input, shape index: {}]   ;;  %s306_s5 = inlined_call_operand.vmem [shape: f32[1,8,128], index: 5, kind: output, shape index: {}]  }
   0x1   :  { %213 = vmatprep.subr.bf16.mxu0 %v242_v0  ;;  %v234_v1 = vld [vmem:[%s301_s1] sm:$0xff]   ;;  %217 = vmatprep.mubr.msk.bf16.mxu0 %vm243_vm0, %v242_v0  ;;  %v235_v2 = vld [vmem:[%s301_s1 + $0x8] sm:$0xff]   ;;  %vm181_vm3 = vcmask 57344  }
   0x2   :  { %221 = vmatprep.subr.bf16.mxu1 %v242_v0  ;;  %225 = vmatprep.mubr.msk.bf16.mxu1 %vm243_vm0, %v242_v0  ;;  %v21_v3 = vld [vmem:[%s302_s0] sm:$0xff]  ;;  %v237_v6 = vld [vmem:[%s303_s3 + $0x8] sm:$0xff]  }
   0x3   :  { %214 = vmatpush3.bf16.msra.mxu0 %v234_v1  ;;  %v22_v4 = vpack.c.bf16 %v21_v3, %v21_v3  ;;  %v236_v5 = vld [vmem:[%s303_s3] sm:$0xff]  }
   0x4   :  { %215 = vmatprep.subr.bf16.mxu0 %v242_v0  ;;  %222 = vmatpush3.bf16.msra.mxu1 %v236_v5  ;;  %v198_v7 = vld [vmem:[%s304_s2] ss:$0 sm:$0xff]  ;;  %s244_s2 = smov 120  }
   0x5   :  { %223 = vmatprep.subr.bf16.mxu1 %v242_v0  ;;  %v202_v15 = vld [vmem:[%s305_s4] ss:$0 sm:$0xff] }
   0x7   :  { %216 = vmatpush3.bf16.msra.mxu0 %v235_v2 }
   0x8   :  { %224 = vmatpush3.bf16.msra.mxu1 %v237_v6 }
   0xa   :  { %218 = vmatmul.mubr.msk.bf16.vlgmr.msra.gmra.mrb[0].mxu0 %vm46_vm1, %v22_v4 }
  0xdd   :  { %v84_v8 = vpop.f32.mrb[0].mxu0 }
  0xde   :  { %v85_v9 = vadd.f32 %v198_v7, %v84_v8  ;;  %v219_v10 = vpop.f32.mrb[1].mxu0 }
  0xdf   :  { %v87_v11 = vpop.f32.mrb[2].mxu0 }
  0xe0   :  { %v90_v12 = vmax.f32 %v85_v9, 0.0  ;;  %v220_v13 = vpop.f32.mrb[3].mxu0 }
  0xe2   :  { %v91_v14 = vpack.c.bf16 %v90_v12, %v90_v12 }
  0xe4   :  { %226 = vmatmul.mubr.msk.bf16.vlgmr.msra.gmra.mrb[0].mxu1 %vm46_vm1, %v91_v14 }
 0x1b7   :  { %v152_v16 = vpop.f32.mrb[0].mxu1 }
 0x1b8   :  { %v153_v17 = vadd.f32 %v202_v15, %v152_v16  ;;  %v227_v18 = vpop.f32.mrb[1].mxu1 }
 0x1b9   :  { %v155_v19 = vpop.f32.mrb[2].mxu1 }
 0x1ba   :  { %238 = vtanh.f32 %v153_v17  ;;  %v228_v20 = vpop.f32.mrb[3].mxu1  ;;  %v159_v24 = vmul.f32 %v153_v17, %v153_v17 }
 0x1c4   :  { %v239_v21 = vpop.eup %238 }
 0x1c5   :  { %v160_v22 = vmul.f32 1.442695, %v239_v21 }
 0x1c7   :  { %240 = vpow2.f32 %v160_v22 }
 0x1d1   :  { %v241_v23 = vpop.eup %240 }
 0x1d2   :  { %163 = vrot.lane.b32.xlu0 %v241_v23, %s244_s2 }
 0x1d6   :  { %169 = vrot.lane.b32.xlu0 %v239_v21, %s244_s2 }
 0x244   :  { %v164_v25 = vpop.permute.xlu0 %163 }
 0x245   :  { %v166_v26 = vadd.f32 %v164_v25, %v159_v24 }
 0x247   :  { %v206_v27 = vadd.f32 -1.0, %v166_v26 }
 0x248   :  { %v170_v28 = vpop.permute.xlu0 %169 }
 0x249   :  { %v172_v29 = vsub.f32 %v206_v27, %v170_v28 }
 0x24b   :  { %v174_v30 = vsel %vm173_vm2, %v172_v29, 0.0 }
 0x24c   :  { %v175_v31 = vrot.slane %v174_v30, 4 }
 0x24e   :  { %v176_v32 = vadd.f32 %v175_v31, %v174_v30 }
 0x250   :  { %v177_v33 = vrot.slane %v176_v32, 2 }
 0x252   :  { %v178_v34 = vadd.f32 %v177_v33, %v176_v32 }
 0x254   :  { %v179_v35 = vrot.slane %v178_v34, 1 }
 0x256   :  { %v180_v36 = vadd.f32 %v179_v35, %v178_v34 }
 0x258   :  { %v182_v37 = vsel %vm181_vm3, %v180_v36, 0.0 }
 0x259   :  { %183 = vadd.xlane.f32.xlu1 %v182_v37 }
 0x2e6   :  { %v184_v38 = vpop.xlane.xlu1 %183 }
 0x2e7   :  { %v185_v39 = vrot.slane %v184_v38, 4 }
 0x2e9   :  { %v186_v40 = vadd.f32 %v185_v39, %v184_v38 }
 0x2eb   :  { %v187_v41 = vrot.slane %v186_v40, 2 }
 0x2ed   :  { %v188_v42 = vadd.f32 %v187_v41, %v186_v40 }
 0x2ef   :  { %v189_v43 = vrot.slane %v188_v42, 1 }
 0x2f1   :  { %v190_v44 = vadd.f32 %v189_v43, %v188_v42 }
 0x2f3   :  { %229 = vpush %v190_v44 }
 0x324   :  { %s230_s3 = spop %229 }
 0x325   :  { %v192_v45 = vstv %s230_s3 }
 0x326   :  { %193 = vst [vmem:[%s306_s5] sm:$0xff] %v192_v45 }

</bundles_post_ra>
